<compile_context>
chip_gen: v6e
topology: v6e:2x2x1
jax: 0.10.0
libtpu: 0.0.40
codegen_flags: <defaults>
</compile_context>

<pallas_src>
import jax
import jax.numpy as jnp
import numpy as np
from jax.experimental import pallas as pl
from jax.experimental.pallas import tpu as pltpu


def _dbmodel_kernel(x_ref, w_ref, o_ref):
    # x_ref: (2, BT, NT)  -- input feature k on the leading axis, N on lanes
    # w_ref: (BT, 33)     -- packed per-sample params, batch on sublanes
    #                        [w1_k0(8) | w1_k1(8) | b1(8) | 0.5*w2(8) | 0.5*b2]
    # o_ref: (BT, NT)     -- lane-dense output slab
    x0 = x_ref[0]                # (BT, NT)
    x1 = x_ref[1]                # (BT, NT)
    w = w_ref[...]               # (BT, 33)

    acc = None
    for j in range(8):           # hidden units: unrolled broadcast-FMA chain
        h = (x0 * w[:, j:j + 1]              # w1[k=0, j]  (BT,1) lane-broadcast
             + x1 * w[:, 8 + j:9 + j]        # w1[k=1, j]
             + w[:, 16 + j:17 + j])          # b1[j]
        h = jnp.maximum(h, 0.0)              # ReLU
        t = h * w[:, 24 + j:25 + j]          # 0.5 * w2[j]  (pre-scaled)
        acc = t if acc is None else acc + t  # hidden reduction = vreg adds

    y_half = acc + w[:, 32:33]               # 0.5 * (h @ w2 + b2)
    # sigmoid(y) = 0.5 * tanh(y/2) + 0.5 ; tanh runs on the EUP, no overflow.
    o_ref[...] = 0.5 * jnp.tanh(y_half) + 0.5


def _round_up(x, m):
    return ((x + m - 1) // m) * m


def _pick_tile(dim, unit, cap):
    """Largest tile that is a multiple of `unit`, at most ~`cap`, minimal pad."""
    full = _round_up(dim, unit)
    if full <= cap:
        return full
    n_blocks = -(-dim // cap)
    return _round_up(-(-dim // n_blocks), unit)


def dbmodel_small_forward(inp, weights, *, b_tile_cap=128, n_tile_cap=4096,
                          vmem_limit_bytes=48 * 1024 * 1024):
    """inp: (B, N, 2) float32, weights: (B, 33) float32 -> (B, N, 1)."""
    B, N, K = inp.shape
    assert K == 2 and weights.shape == (B, 33)

    # ---- wrapper-side glue: lane-dense re-layout + single packed param slab.
    x = jnp.transpose(inp, (2, 0, 1))                       # (2, B, N)
    w1 = weights[:, :16].reshape(B, 8, 2)                   # w1[b, h, k]
    w_packed = jnp.concatenate(
        [w1[:, :, 0], w1[:, :, 1], weights[:, 16:24],
         0.5 * weights[:, 24:32], 0.5 * weights[:, 32:33]], axis=1)  # (B, 33)

    b_tile = _pick_tile(B, 8, b_tile_cap)
    n_tile = _pick_tile(N, 128, n_tile_cap)

    # v7x megacore: make sure there are >= 2 grid steps along a parallel axis.
    n_steps = (_round_up(B, b_tile) // b_tile) * (_round_up(N, n_tile) // n_tile)
    if n_steps < 2:
        if N > 128:                                         # prefer splitting N
            n_tile = _round_up(-(-_round_up(N, 128) // 2), 128)
        elif B > 8:
            b_tile = _round_up(-(-_round_up(B, 8) // 2), 8)

    Bp, Np = _round_up(B, b_tile), _round_up(N, n_tile)
    if Bp != B or Np != N:                                  # zero-pad to grid
        x = jnp.pad(x, ((0, 0), (0, Bp - B), (0, Np - N)))
    if Bp != B:
        w_packed = jnp.pad(w_packed, ((0, Bp - B), (0, 0)))

    grid = (Bp // b_tile, Np // n_tile)                     # N axis innermost

    out2d = pl.pallas_call(
        _dbmodel_kernel,
        out_shape=jax.ShapeDtypeStruct((Bp, Np), inp.dtype),
        grid_spec=pltpu.PrefetchScalarGridSpec(
            num_scalar_prefetch=0,
            grid=grid,
            in_specs=[
                pl.BlockSpec((2, b_tile, n_tile), lambda bi, ni: (0, bi, ni)),
                pl.BlockSpec((b_tile, 33), lambda bi, ni: (bi, 0)),
            ],
            out_specs=pl.BlockSpec((b_tile, n_tile), lambda bi, ni: (bi, ni)),
        ),
        compiler_params=pltpu.CompilerParams(
            dimension_semantics=("parallel", "parallel"),
            vmem_limit_bytes=vmem_limit_bytes),
    )(x, w_packed)

    out2d = out2d if (Bp == B and Np == N) else out2d[:B, :N]
    return out2d[:, :, None]                                # (B, N, 1)


def _reference_forward(inp, weights):
    """Pure-JAX reference mirroring the PyTorch batch_first forward."""
    B = weights.shape[0]
    w1 = weights[:, :16].reshape(B, 8, 2).transpose(0, 2, 1)
    b1 = weights[:, 16:24].reshape(B, 8)
    w2 = weights[:, 24:32].reshape(B, 1, 8).transpose(0, 2, 1)
    b2 = weights[:, 32:33].reshape(B, 1)
    x = jnp.einsum("bnk,bkh->bnh", inp, w1) + b1[:, None, :]
    x = jnp.maximum(x, 0.0)
    x = jnp.einsum("bnh,bho->bno", x, w2) + b2[:, None, :]
    return jax.nn.sigmoid(x)


if __name__ == "__main__":
    key = jax.random.PRNGKey(0)
    k_in, k_w = jax.random.split(key)

    B, N = 8, 512                     # batch of per-sample MLPs, N 2-D points
    inp = jax.random.normal(k_in, (B, N, 2), dtype=jnp.float32)
    weights = jax.random.normal(k_w, (B, 33), dtype=jnp.float32)

    out = dbmodel_small_forward(inp, weights)
    out = jax.block_until_ready(out)

    ref = _reference_forward(inp, weights)
    np.testing.assert_allclose(np.asarray(out), np.asarray(ref),
                               rtol=5e-4, atol=5e-5)
    print("KERNEL_OK")
</pallas_src>

<mosaic_0001>
module attributes {stable_mosaic.version = 11 : i64} {
  func.func @_dbmodel_kernel(%arg0: i32, %arg1: i32, %arg2: memref<2x8x256xf32, #tpu.memory_space<vmem>>, %arg3: memref<8x33xf32, #tpu.memory_space<vmem>>, %arg4: memref<8x256xf32, #tpu.memory_space<vmem>>) attributes {dimension_semantics = [#tpu.dimension_semantics<parallel>, #tpu.dimension_semantics<parallel>], iteration_bounds = array<i64: 1, 2>, scalar_prefetch = 0 : i64, scratch_operands = 0 : i64, tpu.core_type = #tpu.core_type<tc>, window_params = [{transform_indices = @transform_0, window_bounds = array<i64: 2, 8, 256>}, {transform_indices = @transform_1, window_bounds = array<i64: 8, 33>}, {transform_indices = @transform_2, window_bounds = array<i64: 8, 256>}]} {
    %c0 = arith.constant 0 : index
    %c0_0 = arith.constant 0 : index
    %c0_1 = arith.constant 0 : index
    %0 = vector.load %arg2[%c0, %c0_0, %c0_1] : memref<2x8x256xf32, #tpu.memory_space<vmem>>, vector<1x8x256xf32>
    %1 = vector.shape_cast %0 : vector<1x8x256xf32> to vector<8x256xf32>
    %c1 = arith.constant 1 : index
    %c0_2 = arith.constant 0 : index
    %c0_3 = arith.constant 0 : index
    %2 = vector.load %arg2[%c1, %c0_2, %c0_3] : memref<2x8x256xf32, #tpu.memory_space<vmem>>, vector<1x8x256xf32>
    %3 = vector.shape_cast %2 : vector<1x8x256xf32> to vector<8x256xf32>
    %c0_4 = arith.constant 0 : index
    %c0_5 = arith.constant 0 : index
    %4 = vector.load %arg3[%c0_4, %c0_5] : memref<8x33xf32, #tpu.memory_space<vmem>>, vector<8x33xf32>
    %5 = vector.extract_strided_slice %4 {offsets = [0, 0], sizes = [8, 1], strides = [1, 1]} : vector<8x33xf32> to vector<8x1xf32>
    %6 = vector.broadcast %5 : vector<8x1xf32> to vector<8x256xf32>
    %7 = arith.mulf %1, %6 : vector<8x256xf32>
    %8 = vector.extract_strided_slice %4 {offsets = [0, 8], sizes = [8, 1], strides = [1, 1]} : vector<8x33xf32> to vector<8x1xf32>
    %9 = vector.broadcast %8 : vector<8x1xf32> to vector<8x256xf32>
    %10 = arith.mulf %3, %9 : vector<8x256xf32>
    %11 = arith.addf %7, %10 : vector<8x256xf32>
    %12 = vector.extract_strided_slice %4 {offsets = [0, 16], sizes = [8, 1], strides = [1, 1]} : vector<8x33xf32> to vector<8x1xf32>
    %13 = vector.broadcast %12 : vector<8x1xf32> to vector<8x256xf32>
    %14 = arith.addf %11, %13 : vector<8x256xf32>
    %cst = arith.constant 0.000000e+00 : f32
    %15 = vector.broadcast %cst : f32 to vector<8x256xf32>
    %16 = arith.maximumf %14, %15 : vector<8x256xf32>
    %17 = vector.extract_strided_slice %4 {offsets = [0, 24], sizes = [8, 1], strides = [1, 1]} : vector<8x33xf32> to vector<8x1xf32>
    %18 = vector.broadcast %17 : vector<8x1xf32> to vector<8x256xf32>
    %19 = arith.mulf %16, %18 : vector<8x256xf32>
    %20 = vector.extract_strided_slice %4 {offsets = [0, 1], sizes = [8, 1], strides = [1, 1]} : vector<8x33xf32> to vector<8x1xf32>
    %21 = vector.broadcast %20 : vector<8x1xf32> to vector<8x256xf32>
    %22 = arith.mulf %1, %21 : vector<8x256xf32>
    %23 = vector.extract_strided_slice %4 {offsets = [0, 9], sizes = [8, 1], strides = [1, 1]} : vector<8x33xf32> to vector<8x1xf32>
    %24 = vector.broadcast %23 : vector<8x1xf32> to vector<8x256xf32>
    %25 = arith.mulf %3, %24 : vector<8x256xf32>
    %26 = arith.addf %22, %25 : vector<8x256xf32>
    %27 = vector.extract_strided_slice %4 {offsets = [0, 17], sizes = [8, 1], strides = [1, 1]} : vector<8x33xf32> to vector<8x1xf32>
    %28 = vector.broadcast %27 : vector<8x1xf32> to vector<8x256xf32>
    %29 = arith.addf %26, %28 : vector<8x256xf32>
    %cst_6 = arith.constant 0.000000e+00 : f32
    %30 = vector.broadcast %cst_6 : f32 to vector<8x256xf32>
    %31 = arith.maximumf %29, %30 : vector<8x256xf32>
    %32 = vector.extract_strided_slice %4 {offsets = [0, 25], sizes = [8, 1], strides = [1, 1]} : vector<8x33xf32> to vector<8x1xf32>
    %33 = vector.broadcast %32 : vector<8x1xf32> to vector<8x256xf32>
    %34 = arith.mulf %31, %33 : vector<8x256xf32>
    %35 = arith.addf %19, %34 : vector<8x256xf32>
    %36 = vector.extract_strided_slice %4 {offsets = [0, 2], sizes = [8, 1], strides = [1, 1]} : vector<8x33xf32> to vector<8x1xf32>
    %37 = vector.broadcast %36 : vector<8x1xf32> to vector<8x256xf32>
    %38 = arith.mulf %1, %37 : vector<8x256xf32>
    %39 = vector.extract_strided_slice %4 {offsets = [0, 10], sizes = [8, 1], strides = [1, 1]} : vector<8x33xf32> to vector<8x1xf32>
    %40 = vector.broadcast %39 : vector<8x1xf32> to vector<8x256xf32>
    %41 = arith.mulf %3, %40 : vector<8x256xf32>
    %42 = arith.addf %38, %41 : vector<8x256xf32>
    %43 = vector.extract_strided_slice %4 {offsets = [0, 18], sizes = [8, 1], strides = [1, 1]} : vector<8x33xf32> to vector<8x1xf32>
    %44 = vector.broadcast %43 : vector<8x1xf32> to vector<8x256xf32>
    %45 = arith.addf %42, %44 : vector<8x256xf32>
    %cst_7 = arith.constant 0.000000e+00 : f32
    %46 = vector.broadcast %cst_7 : f32 to vector<8x256xf32>
    %47 = arith.maximumf %45, %46 : vector<8x256xf32>
    %48 = vector.extract_strided_slice %4 {offsets = [0, 26], sizes = [8, 1], strides = [1, 1]} : vector<8x33xf32> to vector<8x1xf32>
    %49 = vector.broadcast %48 : vector<8x1xf32> to vector<8x256xf32>
    %50 = arith.mulf %47, %49 : vector<8x256xf32>
    %51 = arith.addf %35, %50 : vector<8x256xf32>
    %52 = vector.extract_strided_slice %4 {offsets = [0, 3], sizes = [8, 1], strides = [1, 1]} : vector<8x33xf32> to vector<8x1xf32>
    %53 = vector.broadcast %52 : vector<8x1xf32> to vector<8x256xf32>
    %54 = arith.mulf %1, %53 : vector<8x256xf32>
    %55 = vector.extract_strided_slice %4 {offsets = [0, 11], sizes = [8, 1], strides = [1, 1]} : vector<8x33xf32> to vector<8x1xf32>
    %56 = vector.broadcast %55 : vector<8x1xf32> to vector<8x256xf32>
    %57 = arith.mulf %3, %56 : vector<8x256xf32>
    %58 = arith.addf %54, %57 : vector<8x256xf32>
    %59 = vector.extract_strided_slice %4 {offsets = [0, 19], sizes = [8, 1], strides = [1, 1]} : vector<8x33xf32> to vector<8x1xf32>
    %60 = vector.broadcast %59 : vector<8x1xf32> to vector<8x256xf32>
    %61 = arith.addf %58, %60 : vector<8x256xf32>
    %cst_8 = arith.constant 0.000000e+00 : f32
    %62 = vector.broadcast %cst_8 : f32 to vector<8x256xf32>
    %63 = arith.maximumf %61, %62 : vector<8x256xf32>
    %64 = vector.extract_strided_slice %4 {offsets = [0, 27], sizes = [8, 1], strides = [1, 1]} : vector<8x33xf32> to vector<8x1xf32>
    %65 = vector.broadcast %64 : vector<8x1xf32> to vector<8x256xf32>
    %66 = arith.mulf %63, %65 : vector<8x256xf32>
    %67 = arith.addf %51, %66 : vector<8x256xf32>
    %68 = vector.extract_strided_slice %4 {offsets = [0, 4], sizes = [8, 1], strides = [1, 1]} : vector<8x33xf32> to vector<8x1xf32>
    %69 = vector.broadcast %68 : vector<8x1xf32> to vector<8x256xf32>
    %70 = arith.mulf %1, %69 : vector<8x256xf32>
    %71 = vector.extract_strided_slice %4 {offsets = [0, 12], sizes = [8, 1], strides = [1, 1]} : vector<8x33xf32> to vector<8x1xf32>
    %72 = vector.broadcast %71 : vector<8x1xf32> to vector<8x256xf32>
    %73 = arith.mulf %3, %72 : vector<8x256xf32>
    %74 = arith.addf %70, %73 : vector<8x256xf32>
    %75 = vector.extract_strided_slice %4 {offsets = [0, 20], sizes = [8, 1], strides = [1, 1]} : vector<8x33xf32> to vector<8x1xf32>
    %76 = vector.broadcast %75 : vector<8x1xf32> to vector<8x256xf32>
    %77 = arith.addf %74, %76 : vector<8x256xf32>
    %cst_9 = arith.constant 0.000000e+00 : f32
    %78 = vector.broadcast %cst_9 : f32 to vector<8x256xf32>
    %79 = arith.maximumf %77, %78 : vector<8x256xf32>
    %80 = vector.extract_strided_slice %4 {offsets = [0, 28], sizes = [8, 1], strides = [1, 1]} : vector<8x33xf32> to vector<8x1xf32>
    %81 = vector.broadcast %80 : vector<8x1xf32> to vector<8x256xf32>
    %82 = arith.mulf %79, %81 : vector<8x256xf32>
    %83 = arith.addf %67, %82 : vector<8x256xf32>
    %84 = vector.extract_strided_slice %4 {offsets = [0, 5], sizes = [8, 1], strides = [1, 1]} : vector<8x33xf32> to vector<8x1xf32>
    %85 = vector.broadcast %84 : vector<8x1xf32> to vector<8x256xf32>
    %86 = arith.mulf %1, %85 : vector<8x256xf32>
    %87 = vector.extract_strided_slice %4 {offsets = [0, 13], sizes = [8, 1], strides = [1, 1]} : vector<8x33xf32> to vector<8x1xf32>
    %88 = vector.broadcast %87 : vector<8x1xf32> to vector<8x256xf32>
    %89 = arith.mulf %3, %88 : vector<8x256xf32>
    %90 = arith.addf %86, %89 : vector<8x256xf32>
    %91 = vector.extract_strided_slice %4 {offsets = [0, 21], sizes = [8, 1], strides = [1, 1]} : vector<8x33xf32> to vector<8x1xf32>
    %92 = vector.broadcast %91 : vector<8x1xf32> to vector<8x256xf32>
    %93 = arith.addf %90, %92 : vector<8x256xf32>
    %cst_10 = arith.constant 0.000000e+00 : f32
    %94 = vector.broadcast %cst_10 : f32 to vector<8x256xf32>
    %95 = arith.maximumf %93, %94 : vector<8x256xf32>
    %96 = vector.extract_strided_slice %4 {offsets = [0, 29], sizes = [8, 1], strides = [1, 1]} : vector<8x33xf32> to vector<8x1xf32>
    %97 = vector.broadcast %96 : vector<8x1xf32> to vector<8x256xf32>
    %98 = arith.mulf %95, %97 : vector<8x256xf32>
    %99 = arith.addf %83, %98 : vector<8x256xf32>
    %100 = vector.extract_strided_slice %4 {offsets = [0, 6], sizes = [8, 1], strides = [1, 1]} : vector<8x33xf32> to vector<8x1xf32>
    %101 = vector.broadcast %100 : vector<8x1xf32> to vector<8x256xf32>
    %102 = arith.mulf %1, %101 : vector<8x256xf32>
    %103 = vector.extract_strided_slice %4 {offsets = [0, 14], sizes = [8, 1], strides = [1, 1]} : vector<8x33xf32> to vector<8x1xf32>
    %104 = vector.broadcast %103 : vector<8x1xf32> to vector<8x256xf32>
    %105 = arith.mulf %3, %104 : vector<8x256xf32>
    %106 = arith.addf %102, %105 : vector<8x256xf32>
    %107 = vector.extract_strided_slice %4 {offsets = [0, 22], sizes = [8, 1], strides = [1, 1]} : vector<8x33xf32> to vector<8x1xf32>
    %108 = vector.broadcast %107 : vector<8x1xf32> to vector<8x256xf32>
    %109 = arith.addf %106, %108 : vector<8x256xf32>
    %cst_11 = arith.constant 0.000000e+00 : f32
    %110 = vector.broadcast %cst_11 : f32 to vector<8x256xf32>
    %111 = arith.maximumf %109, %110 : vector<8x256xf32>
    %112 = vector.extract_strided_slice %4 {offsets = [0, 30], sizes = [8, 1], strides = [1, 1]} : vector<8x33xf32> to vector<8x1xf32>
    %113 = vector.broadcast %112 : vector<8x1xf32> to vector<8x256xf32>
    %114 = arith.mulf %111, %113 : vector<8x256xf32>
    %115 = arith.addf %99, %114 : vector<8x256xf32>
    %116 = vector.extract_strided_slice %4 {offsets = [0, 7], sizes = [8, 1], strides = [1, 1]} : vector<8x33xf32> to vector<8x1xf32>
    %117 = vector.broadcast %116 : vector<8x1xf32> to vector<8x256xf32>
    %118 = arith.mulf %1, %117 : vector<8x256xf32>
    %119 = vector.extract_strided_slice %4 {offsets = [0, 15], sizes = [8, 1], strides = [1, 1]} : vector<8x33xf32> to vector<8x1xf32>
    %120 = vector.broadcast %119 : vector<8x1xf32> to vector<8x256xf32>
    %121 = arith.mulf %3, %120 : vector<8x256xf32>
    %122 = arith.addf %118, %121 : vector<8x256xf32>
    %123 = vector.extract_strided_slice %4 {offsets = [0, 23], sizes = [8, 1], strides = [1, 1]} : vector<8x33xf32> to vector<8x1xf32>
    %124 = vector.broadcast %123 : vector<8x1xf32> to vector<8x256xf32>
    %125 = arith.addf %122, %124 : vector<8x256xf32>
    %cst_12 = arith.constant 0.000000e+00 : f32
    %126 = vector.broadcast %cst_12 : f32 to vector<8x256xf32>
    %127 = arith.maximumf %125, %126 : vector<8x256xf32>
    %128 = vector.extract_strided_slice %4 {offsets = [0, 31], sizes = [8, 1], strides = [1, 1]} : vector<8x33xf32> to vector<8x1xf32>
    %129 = vector.broadcast %128 : vector<8x1xf32> to vector<8x256xf32>
    %130 = arith.mulf %127, %129 : vector<8x256xf32>
    %131 = arith.addf %115, %130 : vector<8x256xf32>
    %132 = vector.extract_strided_slice %4 {offsets = [0, 32], sizes = [8, 1], strides = [1, 1]} : vector<8x33xf32> to vector<8x1xf32>
    %133 = vector.broadcast %132 : vector<8x1xf32> to vector<8x256xf32>
    %134 = arith.addf %131, %133 : vector<8x256xf32>
    %135 = math.tanh %134 : vector<8x256xf32>
    %cst_13 = arith.constant 5.000000e-01 : f32
    %136 = vector.broadcast %cst_13 : f32 to vector<8x256xf32>
    %137 = arith.mulf %136, %135 : vector<8x256xf32>
    %cst_14 = arith.constant 5.000000e-01 : f32
    %138 = vector.broadcast %cst_14 : f32 to vector<8x256xf32>
    %139 = arith.addf %137, %138 : vector<8x256xf32>
    %c0_15 = arith.constant 0 : index
    %c0_16 = arith.constant 0 : index
    %140 = vector.load %arg4[%c0_15, %c0_16] : memref<8x256xf32, #tpu.memory_space<vmem>>, vector<8x256xf32>
    tpu.vector_store %arg4[%c0_15, %c0_16], %139 {strides = array<i32>} : memref<8x256xf32, #tpu.memory_space<vmem>>, vector<8x256xf32>,
    return
  }
  func.func @transform_0(%arg0: i32, %arg1: i32) -> (i32, i32, i32) {
    %c0_i32 = arith.constant 0 : i32
    %c0_i32_0 = arith.constant 0 : i32
    return %c0_i32, %arg0, %arg1 : i32, i32, i32
  }
  func.func @transform_1(%arg0: i32, %arg1: i32) -> (i32, i32) {
    %c0_i32 = arith.constant 0 : i32
    %c0_i32_0 = arith.constant 0 : i32
    return %arg0, %c0_i32 : i32, i32
  }
  func.func @transform_2(%arg0: i32, %arg1: i32) -> (i32, i32) {
    %c0_i32 = arith.constant 0 : i32
    return %arg0, %arg1 : i32, i32
  }
}

</mosaic_0001>

<bundles_post_ra>
// kernel: tpu_custom_call.1
= control target key start
LH: loop header
LB: loop body
LE: loop exit
PB: predicated region body
PF: predicated region fallthrough
CT: control target
= control target key end

     0   :  { %7 = vsyncpa [#allocation3], 0  ;;  %s1190_s0 = inlined_call_operand.hbm [shape: f32[2,8,512], index: 0, kind: input, shape index: {}]   ;;  %s1191_s1 = inlined_call_operand.hbm [shape: f32[8,33], index: 1, kind: input, shape index: {}]   ;;  %s1192_s2 = inlined_call_operand.hbm [shape: f32[8,512], index: 2, kind: output, shape index: {}]  }
   0x1   :  { %9 = vsyncpa [#allocation3 + $0x1], 0 }
   0x2   :  { %10 = vsyncpa [#allocation6], 0 }
   0x3   :  { %11 = vsyncpa [#allocation4], 0 }
   0x4   :  { %13 = vsyncpa [#allocation4 + $0x1], 0  ;;  %s935_s9 = smov 0   ;;  %s937_s10 = smov 0  }
   0x5   :  { %s939_s11 = smov 0   ;;  %s941_s12 = smov 0  }
   0x6   :  { %s943_s13 = smov 0   ;;  %s945_s14 = smov 0  }
   0x7 LB: > { %s574_s15 = sadd.s32 4294967295, %s879_s14   ;;  %s575_s16 = sadd.s32 4294967294, %s879_s14   ;;  %s879_s14 = sphi %s945_s14, %s19_s14   ;;  %s875_s13 = sphi %s943_s13, %s1211_s13   ;;  %s871_s12 = sphi %s941_s12, %s1210_s12   ;;  %s867_s11 = sphi %s939_s11, %s1209_s11   ;;  %s863_s10 = sphi %s937_s10, %s1208_s10   ;;  %s859_s9 = sphi %s935_s9, %s1207_s9  }
   0x8   : > { %s40_s17 = sadd.s32 1, %s867_s11  ;;  %p47_p0 = scmp.ne.s32.totalorder %s867_s11, %s863_s10 }
   0x9   : > { %p48_p1 = scmp.eq.s32.totalorder %s879_s14, 0  ;;  %p53_p2 = scmp.ne.s32.totalorder %s863_s10, %s859_s9 }
   0xa   : > { %p973_p3 = scmp.eq.s32.totalorder %s574_s15, 0  ;;  %p105_p4 = scmp.eq.s32.totalorder %s574_s15, 1 }
   0xb   : > { %p977_p5 = por %p48_p1, %p47_p0  ;;  %p111_p6 = scmp.eq.s32.totalorder %s575_s16, 1 }
   0xc   : > { %p983_p7 = por %p973_p3, %p53_p2  ;;  %p987_p8 = por %p105_p4, %p47_p0 }
   0xd   : > { %p991_p9 = por %p111_p6, %p53_p2  ;;  %p576_p10 = scmp.ge.s32.totalorder %s879_s14, 1 }
   0xe   : > { %s1197_s20 = scalar_select %p983_p7, 1, 0 }
   0xf   : > { %s1198_s21 = scalar_select %p987_p8, 1, 0 }
  0x10   : > { %s1199_s22 = scalar_select %p991_p9, 1, 0 }
  0x11   : > { %p118_p11 = scmp.lt.s32.totalorder %s879_s14, 3  ;;  %s881_s24 = smov [#allocation5]  }
  0x12   : > { %s133_s25 = sshll.u32 %s881_s24, 4  ;;  %p616_p1 = scmp.lt.s32.totalorder %s879_s14, 2  ;;  %s134_s25 = int_to_ptr.vmem [resolvable:$true] %s133_s25 }
  0x13   : > { %p998_p13 = pnand %p576_p10, %p118_p11  ;;  %s28_s28 = sadd.s32 1, %s875_s13 }
  0x14   : > { %p1007_p4 = pnand %p616_p1, %p977_p5  ;;  %p29_p6 = scmp.ge.s32.totalorder %s28_s28, 2 }
  0x15   : > { %p603_p0 = pneg %p998_p13  ;;  %s144_s29 = sand.u32 1, %s867_s11  }
  0x16   : > { %s752_s30 = scalar_lea.vmem %s134_s25, 128  ;;  %p760_p8 = scmp.lt.s32.totalorder %s134_s25, %s134_s25 }
  0x17   : > { %p1013_p2 = pnand %p603_p0, %p973_p3  ;;  %p753_p11 = scmp.ne.s32.totalorder %s134_s25, %s752_s30 }
  0x18   : > { %p761_p5 = scmp.lt.s32.totalorder %s752_s30, %s752_s30 }
  0x19   : > { %p743_p10 = pneg %p1013_p2 }
  0x1a   : > { %p762_p1 = por %p761_p5, %p760_p8 }
  0x1b   : > { %p755_p12 = pnand %p753_p11, %p743_p10 }
  0x1d   : > { %p756_p9 = pneg %p755_p12 }
  0x1f   : > { %p763_p7 = pnand %p762_p1, %p756_p9 }
  0x21   : > { %766 = shalt.err (!%p763_p7)
}
  0x22   : > { %606 = dma.hbm_to_vmem [thread:$0]  (!%p1013_p2), %s1191_s1, 128, %s134_s25, [#allocation6]  }
  0x23   : > { %s1213_s28 = smov (%p29_p6, %s28_s28), 0  ;;  %s579_s5 = sshll.u32 %s144_s29, 5 }
  0x24   : > { %s36_s6 = ssub.s32 %s875_s13, %s1213_s28  ;;  %s593_s7 = sshll.u32 %s875_s13, 8 }
  0x25   : > { %p38_p12 = scmp.eq.s32.totalorder %s36_s6, 0  ;;  %s156_s16 = scalar_lea.hbm %s1190_s0, %s593_s7 }
  0x26   : > { %s148_s19 = scalar_lea.vmem [#allocation2], %s579_s5  ;;  %s145_s30 = scalar_lea.sflag [#allocation3], %s144_s29 }
  0x27   : > { %s157_s24 = sshll.u32 %s148_s19, 4  ;;  %p769_p7 = pneg %p1007_p4  ;;  %s158_s24 = int_to_ptr.vmem [resolvable:$true] %s157_s24 }
  0x28   : > { %s1037_s27 = scalar_select %p38_p12, %s867_s11, %s40_s17  }
  0x29   : > { %s780_s25 = scalar_lea.vmem %s158_s24, 512  ;;  %s882_s3 = smov [#allocation2]  }
  0x2a   : > { %p781_p8 = scmp.ne.s32.totalorder %s158_s24, %s780_s25  ;;  %s785_s4 = sshll.u32 %s882_s3, 4  ;;  %s786_s4 = int_to_ptr.vmem [resolvable:$false] %s785_s4 }
  0x2b   : > { %s787_s6 = scalar_lea.vmem %s786_s4, 1024  ;;  %p788_p2 = scmp.lt.s32.totalorder %s158_s24, %s786_s4 }
  0x2c   : > { %p783_p9 = pnand %p781_p8, %p769_p7  ;;  %p789_p6 = scmp.lt.s32.totalorder %s787_s6, %s780_s25 }
  0x2e   : > { %p784_p0 = pneg %p783_p9  ;;  %p790_p10 = por %p789_p6, %p788_p2 }
  0x30   : > { %p791_p11 = pnand %p790_p10, %p784_p0 }
  0x32   : > { %794 = shalt.err (!%p791_p11)
}
  0x33   : > { %s883_s5 = smov 512   ;;  %s884_s17 = smov 256  }
  0x34   : > { %s885_s7 = smov 16   ;;  %169 = sbr.rel (%p998_p13) target bundleno = 324 (0x144), region = 28 }
  0x35   : > { %610 = dma.hbm_to_vmem [thread:$0]  (!%p1007_p4), %s156_s16, 512, %s158_s24, %s145_s30, %s883_s5, %s884_s17, %s885_s7  }
  0x36   : > { %s1046_s29 = sand.u32 (!%p998_p13), 1, %s863_s10   ;;  %p1203_p5 = scmp.ne.s32.totalorder (!%p998_p13), %s1197_s20, 0 }
  0x37   : > { %s583_s8 = sshll.u32 (!%p998_p13), %s1046_s29, 5  ;;  %s172_s15 = scalar_lea.sflag (!%p998_p13), [#allocation3], %s1046_s29 }
  0x38   : > { %s1050_s19 = scalar_lea.vmem (!%p998_p13), [#allocation2], %s583_s8 }
  0x39   : > { %846 = dma.done.wait (%p1203_p5), %s172_s15, 512  }
  0x3a   : > { %848 = vsyncadd (%p1203_p5), %s172_s15, 4294966784 }
  0x3b   : > { %850 = dma.done.wait (%p973_p3), [#allocation6], 128  }
  0x3c   : > { %852 = vsyncadd (%p973_p3), [#allocation6], 4294967168  ;;  %v886_v0 = vmov 16   ;;  %v887_v1 = vmov 0   ;;  %v1060_v2 = vld [vmem:[#allocation5] sm:$0xff]  ;;  %v888_v3 = vmov 24  }
  0x3d   : > { %706 = vset.pattern.permute.xlu1 %v886_v0  ;;  %704 = vset.pattern.permute.xlu0 %v887_v1  ;;  %v889_v4 = vmov 8   ;;  %v890_v5 = vmov 1   ;;  %v891_v6 = vmov 9   ;;  %v892_v7 = vmov 17   ;;  %v1096_v36 = vld [vmem:[%s1050_s19] sm:$0xff]  ;;  %v1099_v37 = vld [vmem:[%s1050_s19 + $0x8] sm:$0xff] }
  0x3e   : > { %224 = vperm.xlu1 %706, %v1060_v2   ;;  %210 = vperm.xlu0 %704, %v1060_v2   ;;  %v893_v8 = vmov 10   ;;  %v894_v9 = vmov 2   ;;  %v895_v10 = vmov 18   ;;  %v896_v11 = vmov 3   ;;  %v1102_v38 = vld [vmem:[%s1050_s19 + $0x10] sm:$0xff]  ;;  %v1105_v39 = vld [vmem:[%s1050_s19 + $0x18] sm:$0xff] }
  0x3f   : > { %v897_v12 = vmov 25   ;;  %v898_v13 = vmov 11   ;;  %v899_v14 = vmov 13   ;;  %v900_v15 = vmov 4   ;;  %s585_s18 = sshll.u32 %s1046_s29, 4  ;;  %s594_s20 = sshll.u32 %s871_s12, 8 }
  0x40   : > { %v901_v16 = vmov 6   ;;  %v902_v17 = vmov 12   ;;  %v903_v18 = vmov 21   ;;  %v904_v19 = vmov 19   ;;  %s199_s23 = scalar_lea.vmem [#allocation7], %s585_s18  ;;  %s1148_s30 = scalar_lea.hbm %s1192_s2, %s594_s20 }
  0x41   : > { %v905_v20 = vmov 28   ;;  %v906_v21 = vmov 5   ;;  %v907_v22 = vmov 23   ;;  %v908_v23 = vmov 26   ;;  %s478_s26 = sshll.u32 %s199_s23, 4  ;;  %s462_s25 = scalar_lea.sflag [#allocation4], %s1046_s29  ;;  %s479_s26 = int_to_ptr.vmem [resolvable:$true] %s478_s26 }
  0x42   : > { %707 = vset.pattern.permute.xlu1 %v888_v3  ;;  %705 = vset.pattern.permute.xlu0 %v889_v4  ;;  %v909_v24 = vmov 32   ;;  %v910_v25 = vmov 20   ;;  %v911_v26 = vmov 14   ;;  %v912_v27 = vmov 27   ;;  %s795_s3 = scalar_lea.vmem %s479_s26, 256  ;;  %p1204_p13 = scmp.ne.s32.totalorder %s1198_s21, 0 }
  0x43   : > { %232 = vperm.xlu1 %707, %v1060_v2   ;;  %216 = vperm.xlu0 %705, %v1060_v2   ;;  %v913_v28 = vmov 7   ;;  %v914_v29 = vmov 15   ;;  %v915_v30 = vmov 22   ;;  %v916_v31 = vmov 29   ;;  %p796_p3 = scmp.ne.s32.totalorder %s479_s26, %s795_s3  ;;  %s919_s12 = smov [#allocation7]  }
  0x44   : > { %v917_v32 = vmov 30   ;;  %v918_v33 = vmov 31   ;;  %s799_s4 = sshll.u32 %s919_s12, 4  ;;  %s800_s4 = int_to_ptr.vmem [resolvable:$false] %s799_s4 }
  0x45   : > { %p797_p4 = pnand %p796_p3, %p1204_p13  ;;  %s801_s6 = scalar_lea.vmem %s800_s4, 512 }
  0x46   : > { %p802_p12 = scmp.lt.s32.totalorder %s479_s26, %s800_s4  ;;  %p803_p7 = scmp.lt.s32.totalorder %s801_s6, %s795_s3 }
  0x47   : > { %708 = vset.pattern.permute.xlu1 %v890_v5  ;;  %709 = vset.pattern.permute.xlu0 %v891_v6  ;;  %p798_p1 = pneg %p797_p4 }
  0x48   : > { %238 = vperm.xlu1 %708, %v1060_v2   ;;  %244 = vperm.xlu0 %709, %v1060_v2   ;;  %p804_p8 = por %p803_p7, %p802_p12 }
  0x4a   : > { %p805_p9 = pnand %p804_p8, %p798_p1 }
  0x4c   : > { %710 = vset.pattern.permute.xlu1 %v892_v7  ;;  %712 = vset.pattern.permute.xlu0 %v893_v8 }
  0x4d   : > { %252 = vperm.xlu1 %710, %v1060_v2   ;;  %274 = vperm.xlu0 %712, %v1060_v2  }
  0x51   : > { %711 = vset.pattern.permute.xlu1 %v894_v9  ;;  %715 = vset.pattern.permute.xlu0 %v895_v10 }
  0x52   : > { %268 = vperm.xlu1 %711, %v1060_v2   ;;  %282 = vperm.xlu0 %715, %v1060_v2  }
  0x56   : > { %713 = vset.pattern.permute.xlu1 %v896_v11  ;;  %718 = vset.pattern.permute.xlu0 %v897_v12 }
  0x57   : > { %298 = vperm.xlu1 %713, %v1060_v2   ;;  %260 = vperm.xlu0 %718, %v1060_v2  }
  0x5b   : > { %714 = vset.pattern.permute.xlu1 %v898_v13  ;;  %721 = vset.pattern.permute.xlu0 %v899_v14 }
  0x5c   : > { %304 = vperm.xlu1 %714, %v1060_v2   ;;  %364 = vperm.xlu0 %721, %v1060_v2  }
  0x60   : > { %716 = vset.pattern.permute.xlu1 %v900_v15  ;;  %724 = vset.pattern.permute.xlu0 %v901_v16 }
  0x61   : > { %328 = vperm.xlu1 %716, %v1060_v2   ;;  %388 = vperm.xlu0 %724, %v1060_v2  }
  0x65   : > { %717 = vset.pattern.permute.xlu1 %v902_v17  ;;  %727 = vset.pattern.permute.xlu0 %v903_v18 }
  0x66   : > { %334 = vperm.xlu1 %717, %v1060_v2   ;;  %372 = vperm.xlu0 %727, %v1060_v2  }
  0x6a   : > { %719 = vset.pattern.permute.xlu1 %v904_v19  ;;  %730 = vset.pattern.permute.xlu0 %v905_v20 }
  0x6b   : > { %312 = vperm.xlu1 %719, %v1060_v2   ;;  %350 = vperm.xlu0 %730, %v1060_v2  }
  0x6f   : > { %720 = vset.pattern.permute.xlu1 %v906_v21  ;;  %733 = vset.pattern.permute.xlu0 %v907_v22 }
  0x70   : > { %358 = vperm.xlu1 %720, %v1060_v2   ;;  %432 = vperm.xlu0 %733, %v1060_v2  }
  0x74   : > { %722 = vset.pattern.permute.xlu1 %v908_v23  ;;  %736 = vset.pattern.permute.xlu0 %v909_v24 }
  0x75   : > { %290 = vperm.xlu1 %722, %v1060_v2   ;;  %448 = vperm.xlu0 %736, %v1060_v2  }
  0x79   : > { %723 = vset.pattern.permute.xlu1 %v910_v25 }
  0x7a   : > { %342 = vperm.xlu1 %723, %v1060_v2  }
  0x7e   : > { %725 = vset.pattern.permute.xlu1 %v911_v26 }
  0x7f   : > { %394 = vperm.xlu1 %725, %v1060_v2  }
  0x83   : > { %726 = vset.pattern.permute.xlu1 %v912_v27 }
  0x84   : > { %320 = vperm.xlu1 %726, %v1060_v2  }
  0x88   : > { %728 = vset.pattern.permute.xlu1 %v913_v28 }
  0x89   : > { %418 = vperm.xlu1 %728, %v1060_v2  }
  0x8d   : > { %729 = vset.pattern.permute.xlu1 %v914_v29 }
  0x8e   : > { %424 = vperm.xlu1 %729, %v1060_v2  }
  0x92   : > { %731 = vset.pattern.permute.xlu1 %v915_v30 }
  0x93   : > { %402 = vperm.xlu1 %731, %v1060_v2  }
  0x97   : > { %732 = vset.pattern.permute.xlu1 %v916_v31 }
  0x98   : > { %380 = vperm.xlu1 %732, %v1060_v2  }
  0x9c   : > { %734 = vset.pattern.permute.xlu1 %v917_v32 }
  0x9d   : > { %410 = vperm.xlu1 %734, %v1060_v2  }
  0xa1   : > { %735 = vset.pattern.permute.xlu1 %v918_v33 }
  0xa2   : > { %440 = vperm.xlu1 %735, %v1060_v2  }
  0xb9   : > { %v225_v34 = vpop.permute.xlu1 %224  ;;  %v211_v35 = vpop.permute.xlu0 %210 }
  0xba   : > { %v213_v40 = vmul.f32 %v211_v35, %v1096_v36  ;;  %v214_v41 = vmul.f32 %v211_v35, %v1099_v37 }
  0xbe   : > { %v233_v42 = vpop.permute.xlu1 %232  ;;  %v217_v43 = vpop.permute.xlu0 %216 }
  0xbf   : > { %v219_v44 = vmul.f32 %v1102_v38, %v217_v43  ;;  %v220_v45 = vmul.f32 %v1105_v39, %v217_v43 }
  0xc1   : > { %v221_v46 = vadd.f32 %v219_v44, %v213_v40  ;;  %v222_v47 = vadd.f32 %v220_v45, %v214_v41 }
  0xc3   : > { %v227_v48 = vadd.f32 %v225_v34, %v221_v46  ;;  %v228_v49 = vadd.f32 %v225_v34, %v222_v47  ;;  %v239_v50 = vpop.permute.xlu1 %238  ;;  %v245_v63 = vpop.permute.xlu0 %244 }
  0xc4   : > { %v241_v4 = vmul.f32 %v239_v50, %v1096_v36  ;;  %v242_v5 = vmul.f32 %v239_v50, %v1099_v37  ;;  %v247_v6 = vmul.f32 %v1102_v38, %v245_v63  ;;  %v248_v7 = vmul.f32 %v1105_v39, %v245_v63 }
  0xc5   : > { %v229_v51 = vmax.f32 %v227_v48, 0.0  ;;  %v230_v52 = vmax.f32 %v228_v49, 0.0 }
  0xc6   : > { %v249_v10 = vadd.f32 %v247_v6, %v241_v4  ;;  %v250_v11 = vadd.f32 %v248_v7, %v242_v5 }
  0xc7   : > { %v235_v53 = vmul.f32 %v233_v42, %v229_v51  ;;  %v236_v54 = vmul.f32 %v233_v42, %v230_v52 }
  0xc8   : > { %v253_v55 = vpop.permute.xlu1 %252  ;;  %v275_v0 = vpop.permute.xlu0 %274 }
  0xc9   : > { %v277_v12 = vmul.f32 %v1102_v38, %v275_v0  ;;  %v278_v13 = vmul.f32 %v1105_v39, %v275_v0  ;;  %v255_v18 = vadd.f32 %v253_v55, %v249_v10  ;;  %v256_v19 = vadd.f32 %v253_v55, %v250_v11 }
  0xcb   : > { %v257_v23 = vmax.f32 %v255_v18, 0.0  ;;  %v258_v24 = vmax.f32 %v256_v19, 0.0 }
  0xcd   : > { %v269_v56 = vpop.permute.xlu1 %268  ;;  %v283_v3 = vpop.permute.xlu0 %282 }
  0xce   : > { %v271_v14 = vmul.f32 %v269_v56, %v1096_v36  ;;  %v272_v15 = vmul.f32 %v269_v56, %v1099_v37 }
  0xd0   : > { %v279_v20 = vadd.f32 %v277_v12, %v271_v14  ;;  %v280_v21 = vadd.f32 %v278_v13, %v272_v15 }
  0xd2   : > { %v299_v57 = vpop.permute.xlu1 %298  ;;  %v261_v9 = vpop.permute.xlu0 %260  ;;  %v285_v28 = vadd.f32 %v283_v3, %v279_v20  ;;  %v286_v29 = vadd.f32 %v283_v3, %v280_v21 }
  0xd3   : > { %v301_v30 = vmul.f32 %v299_v57, %v1096_v36  ;;  %v302_v31 = vmul.f32 %v299_v57, %v1099_v37  ;;  %v263_v32 = vmul.f32 %v261_v9, %v257_v23  ;;  %v264_v33 = vmul.f32 %v261_v9, %v258_v24 }
  0xd4   : > { %v287_v47 = vmax.f32 %v285_v28, 0.0  ;;  %v288_v48 = vmax.f32 %v286_v29, 0.0 }
  0xd5   : > { %v265_v51 = vadd.f32 %v263_v32, %v235_v53  ;;  %v266_v52 = vadd.f32 %v264_v33, %v236_v54 }
  0xd7   : > { %v305_v58 = vpop.permute.xlu1 %304  ;;  %v365_v17 = vpop.permute.xlu0 %364 }
  0xd8   : > { %v307_v25 = vmul.f32 %v1102_v38, %v305_v58  ;;  %v308_v26 = vmul.f32 %v1105_v39, %v305_v58  ;;  %v367_v34 = vmul.f32 %v1102_v38, %v365_v17  ;;  %v368_v35 = vmul.f32 %v1105_v39, %v365_v17 }
  0xda   : > { %v309_v45 = vadd.f32 %v307_v25, %v301_v30  ;;  %v310_v46 = vadd.f32 %v308_v26, %v302_v31 }
  0xdc   : > { %v329_v59 = vpop.permute.xlu1 %328  ;;  %v389_v27 = vpop.permute.xlu0 %388 }
  0xdd   : > { %v331_v49 = vmul.f32 %v329_v59, %v1096_v36  ;;  %v332_v50 = vmul.f32 %v329_v59, %v1099_v37  ;;  %v392_v3 = vmul.f32 %v389_v27, %v1099_v37 }
  0xe1   : > { %v335_v60 = vpop.permute.xlu1 %334  ;;  %v373_v57 = vpop.permute.xlu0 %372 }
  0xe2   : > { %v337_v40 = vmul.f32 %v1102_v38, %v335_v60  ;;  %v338_v41 = vmul.f32 %v1105_v39, %v335_v60 }
  0xe4   : > { %v339_v63 = vadd.f32 %v337_v40, %v331_v49  ;;  %v340_v0 = vadd.f32 %v338_v41, %v332_v50 }
  0xe6   : > { %v313_v61 = vpop.permute.xlu1 %312  ;;  %v351_v12 = vpop.permute.xlu0 %350 }
  0xe7   : > { %v315_v55 = vadd.f32 %v313_v61, %v309_v45  ;;  %v316_v56 = vadd.f32 %v313_v61, %v310_v46 }
  0xe9   : > { %v317_v61 = vmax.f32 %v315_v55, 0.0  ;;  %v318_v9 = vmax.f32 %v316_v56, 0.0 }
  0xeb   : > { %v359_v62 = vpop.permute.xlu1 %358  ;;  %v433_v26 = vpop.permute.xlu0 %432 }
  0xec   : > { %v361_v42 = vmul.f32 %v359_v62, %v1096_v36  ;;  %v362_v43 = vmul.f32 %v359_v62, %v1099_v37  ;;  %v391_v62 = vmul.f32 %v389_v27, %v1096_v36 }
  0xee   : > { %v369_v58 = vadd.f32 %v367_v34, %v361_v42  ;;  %v370_v60 = vadd.f32 %v368_v35, %v362_v43 }
  0xf0   : > { %v1111_v1 = vpop.permute.xlu1 %290  ;;  %v375_v13 = vadd.f32 %v373_v57, %v369_v58  ;;  %v376_v14 = vadd.f32 %v373_v57, %v370_v60  ;;  %v449_v56 = vpop.permute.xlu0 %448 }
  0xf1   : > { %v293_v10 = vmul.f32 %v1111_v1, %v287_v47  ;;  %v294_v11 = vmul.f32 %v1111_v1, %v288_v48 }
  0xf2   : > { %v377_v28 = vmax.f32 %v375_v13, 0.0  ;;  %v378_v29 = vmax.f32 %v376_v14, 0.0 }
  0xf3   : > { %v295_v24 = vadd.f32 %v293_v10, %v265_v51  ;;  %v296_v25 = vadd.f32 %v294_v11, %v266_v52 }
  0xf5   : > { %v343_v2 = vpop.permute.xlu1 %342 }
  0xf6   : > { %v345_v7 = vadd.f32 %v343_v2, %v339_v63  ;;  %v346_v59 = vadd.f32 %v343_v2, %v340_v0 }
  0xf8   : > { %v348_v20 = vmax.f32 %v346_v59, 0.0 }
  0xfa   : > { %v395_v8 = vpop.permute.xlu1 %394 }
  0xfb   : > { %v397_v4 = vmul.f32 %v1102_v38, %v395_v8  ;;  %v398_v5 = vmul.f32 %v1105_v39, %v395_v8 }
  0xfd   : > { %v399_v2 = vadd.f32 %v397_v4, %v391_v62  ;;  %v400_v19 = vadd.f32 %v398_v5, %v392_v3 }
  0xff   : > { %v321_v16 = vpop.permute.xlu1 %320 }
 0x100   : > { %v323_v17 = vmul.f32 %v321_v16, %v317_v61  ;;  %v324_v18 = vmul.f32 %v321_v16, %v318_v9 }
 0x102   : > { %v325_v30 = vadd.f32 %v323_v17, %v295_v24 }
 0x104   : > { %v419_v22 = vpop.permute.xlu1 %418 }
 0x105   : > { %v421_v15 = vmul.f32 %v419_v22, %v1096_v36  ;;  %v422_v8 = vmul.f32 %v419_v22, %v1099_v37  ;;  %v326_v36 = vadd.f32 %v324_v18, %v296_v25  ;;  %v354_v37 = vmul.f32 %v351_v12, %v348_v20 }
 0x107   : > { %v356_v42 = vadd.f32 %v354_v37, %v326_v36 }
 0x109   : > { %v425_v44 = vpop.permute.xlu1 %424 }
 0x10a   : > { %v427_v53 = vmul.f32 %v1102_v38, %v425_v44  ;;  %v428_v54 = vmul.f32 %v1105_v39, %v425_v44  ;;  %v347_v38 = vmax.f32 %v345_v7, 0.0 }
 0x10c   : > { %v429_v39 = vadd.f32 %v427_v53, %v421_v15  ;;  %v430_v21 = vadd.f32 %v428_v54, %v422_v8  ;;  %v353_v31 = vmul.f32 %v351_v12, %v347_v38 }
 0x10e   : > { %v403_v6 = vpop.permute.xlu1 %402  ;;  %v435_v22 = vadd.f32 %v433_v26, %v429_v39  ;;  %v436_v16 = vadd.f32 %v433_v26, %v430_v21  ;;  %v355_v41 = vadd.f32 %v353_v31, %v325_v30 }
 0x10f   : > { %v405_v1 = vadd.f32 %v403_v6, %v399_v2  ;;  %v406_v27 = vadd.f32 %v403_v6, %v400_v19 }
 0x110   : > { %v437_v45 = vmax.f32 %v435_v22, 0.0  ;;  %v438_v46 = vmax.f32 %v436_v16, 0.0 }
 0x111   : > { %v407_v32 = vmax.f32 %v405_v1, 0.0  ;;  %v408_v33 = vmax.f32 %v406_v27, 0.0 }
 0x113   : > { %v381_v23 = vpop.permute.xlu1 %380 }
 0x114   : > { %v383_v34 = vmul.f32 %v381_v23, %v377_v28  ;;  %v384_v35 = vmul.f32 %v381_v23, %v378_v29 }
 0x116   : > { %v385_v47 = vadd.f32 %v383_v34, %v355_v41  ;;  %v386_v48 = vadd.f32 %v384_v35, %v356_v42 }
 0x118   : > { %v411_v40 = vpop.permute.xlu1 %410 }
 0x119   : > { %v413_v43 = vmul.f32 %v411_v40, %v407_v32  ;;  %v414_v44 = vmul.f32 %v411_v40, %v408_v33 }
 0x11b   : > { %v415_v50 = vadd.f32 %v413_v43, %v385_v47  ;;  %v416_v51 = vadd.f32 %v414_v44, %v386_v48 }
 0x11d   : > { %v441_v49 = vpop.permute.xlu1 %440 }
 0x11e   : > { %v443_v52 = vmul.f32 %v441_v49, %v437_v45  ;;  %v444_v55 = vmul.f32 %v441_v49, %v438_v46 }
 0x120   : > { %v445_v57 = vadd.f32 %v443_v52, %v415_v50  ;;  %v446_v58 = vadd.f32 %v444_v55, %v416_v51 }
 0x122   : > { %v451_v60 = vadd.f32 %v449_v56, %v445_v57  ;;  %v452_v63 = vadd.f32 %v449_v56, %v446_v58 }
 0x124   : > { %737 = vtanh.f32 %v451_v60 }
 0x125   : > { %739 = vtanh.f32 %v452_v63 }
 0x131   : > { %v738_v0 = vpop.eup %737 }
 0x132   : > { %v740_v62 = vpop.eup %739  ;;  %v455_v3 = vmul.f32 0.5, %v738_v0 }
 0x133   : > { %v456_v4 = vmul.f32 0.5, %v740_v62 }
 0x134   : > { %v457_v5 = vadd.f32 0.5, %v455_v3 }
 0x135   : > { %v458_v6 = vadd.f32 0.5, %v456_v4 }
 0x136   : > { %459 = vst [vmem:[%s199_s23] sm:$0xff] %v457_v5 }
 0x137   : > { %460 = vst [vmem:[%s199_s23 + $0x8] sm:$0xff] %v458_v6 }
 0x138   : > { %808 = shalt.err (!%p805_p9)
}
 0x139   : > { %s809_s5 = scalar_lea.hbm %s1148_s30, 256  ;;  %s813_s29 = scalar_lea.hbm %s1192_s2, 512 }
 0x13a   : > { %p810_p0 = scmp.ne.s32.totalorder %s1148_s30, %s809_s5  ;;  %p814_p10 = scmp.lt.s32.totalorder %s1148_s30, %s1192_s2 }
 0x13b   : > { %p815_p11 = scmp.lt.s32.totalorder %s813_s29, %s809_s5 }
 0x13c   : > { %p811_p2 = pnand %p810_p0, %p1204_p13 }
 0x13d   : > { %p816_p5 = por %p815_p11, %p814_p10 }
 0x13e   : > { %p812_p6 = pneg %p811_p2 }
 0x140   : > { %p817_p3 = pnand %p816_p5, %p812_p6 }
 0x142   : > { %820 = shalt.err (!%p817_p3)
}
 0x143   : > { %601 = dma.vmem_to_hbm [thread:$0]  (%p1204_p13), %s479_s26, 256, %s1148_s30, %s462_s25  }
 0x144 PF: > { %s490_s19 = sand.u32 1, %s859_s9   ;;  %p1205_p4 = scmp.ne.s32.totalorder %s1199_s22, 0 }
 0x145   : > { %p1206_p1 = scmp.ge.s32.totalorder %s879_s14, 2  ;;  %s491_s18 = scalar_lea.sflag [#allocation4], %s490_s19 }
 0x147   : > { %p612_p12 = pnand %p1206_p1, %p1205_p4 }
 0x149   : > { %p613_p7 = pneg %p612_p12 }
 0x14b   : > { %854 = dma.done.wait (%p613_p7), %s491_s18, 256  }
 0x14c   : > { %856 = vsyncadd (%p613_p7), %s491_s18, 4294967040  ;;  %s19_s14 = sadd.s32 1, %s879_s14   ;;  %s1207_s9 = smov %s863_s10 }
 0x14d   : > { %p16_p8 = scmp.ge.s32.totalorder %s19_s14, 4   ;;  %s1208_s10 = smov %s867_s11 }
 0x14e   : > { %s1209_s11 = smov %s1037_s27  ;;  %s1210_s12 = smov %s875_s13 }
 0x14f   : > { %s1211_s13 = smov %s1213_s28  ;;  %18 = sbr.rel (!%p16_p8) target bundleno = 7 (0x7), region = 79 }
 0x154   :  { %496 = vsyncpa [#allocation3], 1 }
 0x155   :  { %498 = vsyncpa [#allocation3 + $0x1], 1 }
 0x156   :  { %499 = vsyncpa [#allocation6], 1 }
 0x157   :  { %500 = vsyncpa [#allocation4], 1 }
 0x158   :  { %502 = vsyncpa [#allocation4 + $0x1], 1 }

</bundles_post_ra>
